<compile_context>
chip_gen: v5e
topology: v5e:2x2
jax: 0.10.0
libtpu: 0.0.40
codegen_flags: <defaults>
</compile_context>

<pallas_src>
import functools
import math

import jax
import jax.numpy as jnp
from jax import lax
from jax.experimental import pallas as pl
from jax.experimental.pallas import tpu as pltpu


def _msa_kernel(x_ref, wqkv_ref, bqkv_ref, wproj_ref, bproj_ref, o_ref,
                merged_ref, *, num_heads, head_dim):
    # x_ref:      (bb, T, E)   blocked batch rows
    # wqkv_ref:   (E, 3E)      block-diagonal per-head qkv weight, q-block
    #                          pre-scaled by 1/sqrt(head_dim)
    # bqkv_ref:   (1, 3E)      f32, q bias pre-scaled
    # wproj_ref:  (E, E)       proj weight, pre-transposed to (in, out)
    # bproj_ref:  (1, E)       f32
    # o_ref:      (bb, T, E)
    # merged_ref: (bb, T, E)   f32 VMEM scratch holding the merged heads
    bb, T, E = x_ref.shape
    cdt = wqkv_ref.dtype  # compute dtype for MXU inputs (f32 or bf16)

    # Fused per-head QKV projection: one (bb*T, E) x (E, 3E) MXU matmul.
    # No per-head scaling is needed below (folded into the weights).
    x2 = x_ref[...].reshape(bb * T, E)
    qkv = jnp.dot(x2, wqkv_ref[...], preferred_element_type=jnp.float32)
    qkv = (qkv + bqkv_ref[...]).reshape(bb, T, 3 * E)            # f32

    # Per-head attention, batched over the blocked batch rows.
    for h in range(num_heads):
        lo = h * head_dim
        hi = lo + head_dim
        qh = qkv[:, :, lo:hi].astype(cdt)                        # (bb, T, hd)
        kh = qkv[:, :, E + lo:E + hi].astype(cdt)
        vh = qkv[:, :, 2 * E + lo:2 * E + hi].astype(cdt)

        s = jnp.einsum("bqd,bkd->bqk", qh, kh,
                       preferred_element_type=jnp.float32)       # (bb, T, T)
        s = s - jnp.max(s, axis=-1, keepdims=True)
        p = jnp.exp(s)
        l = jnp.sum(p, axis=-1, keepdims=True)                   # (bb, T, 1)
        # Normalize AFTER p@v: T*hd divides instead of T*T, and the divide is
        # an EUP approx reciprocal (separate VLIW slot).
        pv = jnp.einsum("bqk,bkd->bqd", p.astype(cdt), vh,
                        preferred_element_type=jnp.float32)      # (bb, T, hd)
        merged_ref[:, :, lo:hi] = pv * pl.reciprocal(l, approx=True)

    # Single full-width output projection: (bb*T, E) x (E, E).
    merged = merged_ref[...].reshape(bb * T, E).astype(wproj_ref.dtype)
    out = jnp.dot(merged, wproj_ref[...], preferred_element_type=jnp.float32)
    out = out + bproj_ref[...]
    # proj_drop has p=0.0 -> identity.
    o_ref[...] = out.reshape(bb, T, E).astype(o_ref.dtype)


def preprocess_msa_weights(w_qkv, b_qkv, w_proj, b_proj, num_heads,
                           compute_dtype=jnp.float32):
    """One-time weight preprocessing.  Call ONCE and reuse the result; do not
    re-run per forward call (the kron/concat/transpose and their HBM traffic
    would cost as much as the kernel at these sizes).

    w_qkv:  (3*head_dim, head_dim)   PyTorch nn.Linear weight of Attention.qkv
    b_qkv:  (3*head_dim,)
    w_proj: (E, E)                   PyTorch nn.Linear weight of MSA.proj
    b_proj: (E,)
    """
    three_hd, hd = w_qkv.shape
    assert three_hd == 3 * hd
    E = num_heads * hd
    assert w_proj.shape == (E, E)
    scale = 1.0 / math.sqrt(hd)

    wq, wk, wv = w_qkv[0:hd], w_qkv[hd:2 * hd], w_qkv[2 * hd:3 * hd]
    bq, bk, bv = b_qkv[0:hd], b_qkv[hd:2 * hd], b_qkv[2 * hd:3 * hd]

    # nn.Linear computes y = x @ W.T + b; the qkv linear is applied to every
    # head's head_dim slice with the SAME weight -> block-diagonal expansion.
    # Fold the 1/sqrt(head_dim) attention scale into the q block + q bias.
    eye = jnp.eye(num_heads, dtype=jnp.float32)
    wq_bd = jnp.kron(eye, wq.T.astype(jnp.float32)) * scale      # (E, E)
    wk_bd = jnp.kron(eye, wk.T.astype(jnp.float32))
    wv_bd = jnp.kron(eye, wv.T.astype(jnp.float32))
    w_qkv_big = jnp.concatenate([wq_bd, wk_bd, wv_bd],
                                axis=1).astype(compute_dtype)    # (E, 3E)
    b_qkv_big = jnp.concatenate([
        jnp.tile(bq.astype(jnp.float32) * scale, num_heads),
        jnp.tile(bk.astype(jnp.float32), num_heads),
        jnp.tile(bv.astype(jnp.float32), num_heads),
    ]).reshape(1, 3 * E)                                         # (1, 3E) f32
    w_proj_t = w_proj.T.astype(compute_dtype)                    # (E, E)
    b_proj2 = b_proj.astype(jnp.float32).reshape(1, E)           # (1, E) f32
    return w_qkv_big, b_qkv_big, w_proj_t, b_proj2


def msa_forward(x, params, num_heads, *, num_grid_steps=None):
    """MSA forward.  `params` = preprocess_msa_weights(...) output.

    num_grid_steps: batch-blocking of the grid.  Default keeps 2 "parallel"
    steps when B >= 2 (required to use both v7x TensorCores); pass 1 on
    single-TC chips (v5e/v6e) to merge the whole batch into one step.
    """
    w_qkv_big, b_qkv_big, w_proj_t, b_proj2 = params
    B, T, E = x.shape
    assert E % num_heads == 0, "num heads should be a multiple of embed_dim"
    hd = E // num_heads
    assert w_qkv_big.shape == (E, 3 * E)
    assert w_proj_t.shape == (E, E)

    if num_grid_steps is None:
        num_grid_steps = 2 if B >= 2 else 1
    if B % num_grid_steps != 0:
        num_grid_steps = 1
    bb = B // num_grid_steps

    x_c = x.astype(w_qkv_big.dtype)

    kernel = functools.partial(_msa_kernel, num_heads=num_heads, head_dim=hd)

    flops = B * (2 * T * E * 3 * E        # qkv projection
                 + 4 * T * T * E          # q k^T and p v across all heads
                 + 2 * T * E * E)         # output projection
    bytes_accessed = int(
        x_c.size * x_c.dtype.itemsize
        + w_qkv_big.size * w_qkv_big.dtype.itemsize
        + w_proj_t.size * w_proj_t.dtype.itemsize
        + 4 * (b_qkv_big.size + b_proj2.size + B * T * E))
    cost = pl.CostEstimate(flops=flops,
                           transcendentals=B * num_heads * T * (T + 1),
                           bytes_accessed=bytes_accessed)

    out = pl.pallas_call(
        kernel,
        out_shape=jax.ShapeDtypeStruct((B, T, E), x.dtype),
        grid_spec=pltpu.PrefetchScalarGridSpec(
            num_scalar_prefetch=0,
            grid=(num_grid_steps,),
            in_specs=[
                pl.BlockSpec((bb, T, E), lambda b: (b, 0, 0)),     # x block
                pl.BlockSpec((E, 3 * E), lambda b: (0, 0)),        # W_qkv (bd)
                pl.BlockSpec((1, 3 * E), lambda b: (0, 0)),        # b_qkv
                pl.BlockSpec((E, E), lambda b: (0, 0)),            # W_proj^T
                pl.BlockSpec((1, E), lambda b: (0, 0)),            # b_proj
            ],
            out_specs=pl.BlockSpec((bb, T, E), lambda b: (b, 0, 0)),
            scratch_shapes=[pltpu.VMEM((bb, T, E), jnp.float32)],  # merged heads
        ),
        compiler_params=pltpu.CompilerParams(
            dimension_semantics=("parallel",),
        ),
        cost_estimate=cost,
    )(x_c, w_qkv_big, b_qkv_big, w_proj_t, b_proj2)
    return out


if __name__ == "__main__":
    # Module defaults: num_heads=8, embed_dim=128 -> head_dim=16.
    B, T = 2, 8
    num_heads = 8
    embed_dim = 128
    hd = embed_dim // num_heads

    key = jax.random.PRNGKey(0)
    kx, kw1, kb1, kw2, kb2 = jax.random.split(key, 5)
    x = jax.random.normal(kx, (B, T, embed_dim), dtype=jnp.float32)
    w_qkv = jax.random.normal(kw1, (3 * hd, hd), dtype=jnp.float32) * 0.02
    b_qkv = jax.random.normal(kb1, (3 * hd,), dtype=jnp.float32) * 0.02
    w_proj = jax.random.normal(kw2, (embed_dim, embed_dim), dtype=jnp.float32) * 0.02
    b_proj = jax.random.normal(kb2, (embed_dim,), dtype=jnp.float32) * 0.02

    # One-time weight preprocessing, hoisted out of the forward path.
    params = jax.block_until_ready(
        preprocess_msa_weights(w_qkv, b_qkv, w_proj, b_proj, num_heads))

    fwd = jax.jit(functools.partial(msa_forward, num_heads=num_heads))
    out = jax.block_until_ready(fwd(x, params))

    # --- pure-JAX reference mirroring the PyTorch MSA forward exactly ---
    xh = x.reshape(B, T, num_heads, hd).transpose(0, 2, 1, 3)      # (B, H, T, hd)
    qkv = xh @ w_qkv.T + b_qkv                                     # (B, H, T, 3hd)
    q, k, v = qkv[..., :hd], qkv[..., hd:2 * hd], qkv[..., 2 * hd:]
    s = jnp.einsum("bhqd,bhkd->bhqk", q, k) / math.sqrt(hd)
    p = jax.nn.softmax(s, axis=-1)
    attn = jnp.einsum("bhqk,bhkd->bhqd", p, v)                     # (B, H, T, hd)
    attn = attn.transpose(0, 2, 1, 3).reshape(B, T, embed_dim)
    ref = attn @ w_proj.T + b_proj                                 # proj_drop(p=0) = id

    assert out.shape == (B, T, embed_dim)
    err = float(jnp.max(jnp.abs(out - ref)))
    # 1e-3 tolerance: pl.reciprocal(approx=True) is an EUP approximation.
    assert jnp.allclose(out, ref, atol=1e-3, rtol=1e-3), err

    print("KERNEL_OK")
</pallas_src>

<mosaic_0001>
module attributes {stable_mosaic.version = 11 : i64} {
  func.func @_msa_kernel(%arg0: i32, %arg1: memref<1x8x128xf32, #tpu.memory_space<vmem>>, %arg2: memref<128x384xf32, #tpu.memory_space<vmem>>, %arg3: memref<1x384xf32, #tpu.memory_space<vmem>>, %arg4: memref<128x128xf32, #tpu.memory_space<vmem>>, %arg5: memref<1x128xf32, #tpu.memory_space<vmem>>, %arg6: memref<1x8x128xf32, #tpu.memory_space<vmem>>, %arg7: memref<1x8x128xf32, #tpu.memory_space<vmem>>) attributes {dimension_semantics = [#tpu.dimension_semantics<parallel>], iteration_bounds = array<i64: 2>, scalar_prefetch = 0 : i64, scratch_operands = 1 : i64, tpu.core_type = #tpu.core_type<tc>, window_params = [{transform_indices = @transform_0, window_bounds = array<i64: 1, 8, 128>}, {pipeline_mode = #tpu.pipeline_mode<synchronous>, transform_indices = @transform_1, window_bounds = array<i64: 128, 384>}, {pipeline_mode = #tpu.pipeline_mode<synchronous>, transform_indices = @transform_2, window_bounds = array<i64: 1, 384>}, {pipeline_mode = #tpu.pipeline_mode<synchronous>, transform_indices = @transform_3, window_bounds = array<i64: 128, 128>}, {pipeline_mode = #tpu.pipeline_mode<synchronous>, transform_indices = @transform_4, window_bounds = array<i64: 1, 128>}, {transform_indices = @transform_5, window_bounds = array<i64: 1, 8, 128>}]} {
    %c0 = arith.constant 0 : index
    %c0_0 = arith.constant 0 : index
    %c0_1 = arith.constant 0 : index
    %0 = vector.load %arg1[%c0, %c0_0, %c0_1] : memref<1x8x128xf32, #tpu.memory_space<vmem>>, vector<1x8x128xf32>
    %1 = vector.shape_cast %0 : vector<1x8x128xf32> to vector<8x128xf32>
    %c0_2 = arith.constant 0 : index
    %c0_3 = arith.constant 0 : index
    %2 = vector.load %arg2[%c0_2, %c0_3] : memref<128x384xf32, #tpu.memory_space<vmem>>, vector<128x384xf32>
    %cst = arith.constant dense<0.000000e+00> : vector<8x384xf32>
    %3 = tpu.matmul %1, %2, %cst {dimension_numbers = #tpu.dot_dimension_numbers<[1], [0], [0], [1], [0, 0, 1, 1], [], []>} : vector<8x128xf32>, vector<128x384xf32>, vector<8x384xf32> -> vector<8x384xf32>
    %c0_4 = arith.constant 0 : index
    %c0_5 = arith.constant 0 : index
    %4 = vector.load %arg3[%c0_4, %c0_5] : memref<1x384xf32, #tpu.memory_space<vmem>>, vector<1x384xf32>
    %5 = vector.broadcast %4 : vector<1x384xf32> to vector<8x384xf32>
    %6 = arith.addf %3, %5 : vector<8x384xf32>
    %7 = vector.shape_cast %6 : vector<8x384xf32> to vector<1x8x384xf32>
    %8 = vector.extract_strided_slice %7 {offsets = [0, 0, 0], sizes = [1, 8, 16], strides = [1, 1, 1]} : vector<1x8x384xf32> to vector<1x8x16xf32>
    %9 = vector.extract_strided_slice %7 {offsets = [0, 0, 128], sizes = [1, 8, 16], strides = [1, 1, 1]} : vector<1x8x384xf32> to vector<1x8x16xf32>
    %10 = vector.extract_strided_slice %7 {offsets = [0, 0, 256], sizes = [1, 8, 16], strides = [1, 1, 1]} : vector<1x8x384xf32> to vector<1x8x16xf32>
    "tpu.trace_start"() <{level = 10 : i32, message = "bqd,bkd->bqk"}> : () -> ()
    %cst_6 = arith.constant dense<0.000000e+00> : vector<1x8x8xf32>
    %11 = tpu.matmul %8, %9, %cst_6 {dimension_numbers = #tpu.dot_dimension_numbers<[2], [2], [1], [1], [0, 0, 0, 1, 1, 1], [0], [0]>} : vector<1x8x16xf32>, vector<1x8x16xf32>, vector<1x8x8xf32> -> vector<1x8x8xf32>
    "tpu.trace_stop"() : () -> ()
    %cst_7 = arith.constant dense<0xFF800000> : vector<1x8xf32>
    %12 = vector.multi_reduction <maximumf>, %11, %cst_7 [2] : vector<1x8x8xf32> to vector<1x8xf32>
    %13 = vector.shape_cast %12 : vector<1x8xf32> to vector<1x8x1xf32>
    %14 = vector.broadcast %13 : vector<1x8x1xf32> to vector<1x8x8xf32>
    %15 = arith.subf %11, %14 : vector<1x8x8xf32>
    %16 = math.exp %15 : vector<1x8x8xf32>
    %cst_8 = arith.constant dense<0.000000e+00> : vector<1x8xf32>
    %17 = vector.multi_reduction <add>, %16, %cst_8 [2] : vector<1x8x8xf32> to vector<1x8xf32>
    %18 = vector.shape_cast %17 : vector<1x8xf32> to vector<1x8x1xf32>
    "tpu.trace_start"() <{level = 10 : i32, message = "bqk,bkd->bqd"}> : () -> ()
    %cst_9 = arith.constant dense<0.000000e+00> : vector<1x8x16xf32>
    %19 = tpu.matmul %16, %10, %cst_9 {dimension_numbers = #tpu.dot_dimension_numbers<[2], [1], [1], [2], [0, 0, 0, 1, 1, 2], [0], [0]>} : vector<1x8x8xf32>, vector<1x8x16xf32>, vector<1x8x16xf32> -> vector<1x8x16xf32>
    "tpu.trace_stop"() : () -> ()
    %20 = tpu.reciprocal %18 {approx = true} : vector<1x8x1xf32> -> vector<1x8x1xf32>
    %21 = vector.broadcast %20 : vector<1x8x1xf32> to vector<1x8x16xf32>
    %22 = arith.mulf %19, %21 : vector<1x8x16xf32>
    %c0_10 = arith.constant 0 : index
    %c0_11 = arith.constant 0 : index
    %c0_12 = arith.constant 0 : index
    %23 = vector.load %arg7[%c0_10, %c0_11, %c0_12] : memref<1x8x128xf32, #tpu.memory_space<vmem>>, vector<1x8x16xf32>
    tpu.vector_store %arg7[%c0_10, %c0_11, %c0_12], %22 {strides = array<i32>} : memref<1x8x128xf32, #tpu.memory_space<vmem>>, vector<1x8x16xf32>,
    %24 = vector.extract_strided_slice %7 {offsets = [0, 0, 16], sizes = [1, 8, 16], strides = [1, 1, 1]} : vector<1x8x384xf32> to vector<1x8x16xf32>
    %25 = vector.extract_strided_slice %7 {offsets = [0, 0, 144], sizes = [1, 8, 16], strides = [1, 1, 1]} : vector<1x8x384xf32> to vector<1x8x16xf32>
    %26 = vector.extract_strided_slice %7 {offsets = [0, 0, 272], sizes = [1, 8, 16], strides = [1, 1, 1]} : vector<1x8x384xf32> to vector<1x8x16xf32>
    "tpu.trace_start"() <{level = 10 : i32, message = "bqd,bkd->bqk"}> : () -> ()
    %cst_13 = arith.constant dense<0.000000e+00> : vector<1x8x8xf32>
    %27 = tpu.matmul %24, %25, %cst_13 {dimension_numbers = #tpu.dot_dimension_numbers<[2], [2], [1], [1], [0, 0, 0, 1, 1, 1], [0], [0]>} : vector<1x8x16xf32>, vector<1x8x16xf32>, vector<1x8x8xf32> -> vector<1x8x8xf32>
    "tpu.trace_stop"() : () -> ()
    %cst_14 = arith.constant dense<0xFF800000> : vector<1x8xf32>
    %28 = vector.multi_reduction <maximumf>, %27, %cst_14 [2] : vector<1x8x8xf32> to vector<1x8xf32>
    %29 = vector.shape_cast %28 : vector<1x8xf32> to vector<1x8x1xf32>
    %30 = vector.broadcast %29 : vector<1x8x1xf32> to vector<1x8x8xf32>
    %31 = arith.subf %27, %30 : vector<1x8x8xf32>
    %32 = math.exp %31 : vector<1x8x8xf32>
    %cst_15 = arith.constant dense<0.000000e+00> : vector<1x8xf32>
    %33 = vector.multi_reduction <add>, %32, %cst_15 [2] : vector<1x8x8xf32> to vector<1x8xf32>
    %34 = vector.shape_cast %33 : vector<1x8xf32> to vector<1x8x1xf32>
    "tpu.trace_start"() <{level = 10 : i32, message = "bqk,bkd->bqd"}> : () -> ()
    %cst_16 = arith.constant dense<0.000000e+00> : vector<1x8x16xf32>
    %35 = tpu.matmul %32, %26, %cst_16 {dimension_numbers = #tpu.dot_dimension_numbers<[2], [1], [1], [2], [0, 0, 0, 1, 1, 2], [0], [0]>} : vector<1x8x8xf32>, vector<1x8x16xf32>, vector<1x8x16xf32> -> vector<1x8x16xf32>
    "tpu.trace_stop"() : () -> ()
    %36 = tpu.reciprocal %34 {approx = true} : vector<1x8x1xf32> -> vector<1x8x1xf32>
    %37 = vector.broadcast %36 : vector<1x8x1xf32> to vector<1x8x16xf32>
    %38 = arith.mulf %35, %37 : vector<1x8x16xf32>
    %c0_17 = arith.constant 0 : index
    %c0_18 = arith.constant 0 : index
    %c16 = arith.constant 16 : index
    %39 = vector.load %arg7[%c0_17, %c0_18, %c16] : memref<1x8x128xf32, #tpu.memory_space<vmem>>, vector<1x8x16xf32>
    tpu.vector_store %arg7[%c0_17, %c0_18, %c16], %38 {strides = array<i32>} : memref<1x8x128xf32, #tpu.memory_space<vmem>>, vector<1x8x16xf32>,
    %40 = vector.extract_strided_slice %7 {offsets = [0, 0, 32], sizes = [1, 8, 16], strides = [1, 1, 1]} : vector<1x8x384xf32> to vector<1x8x16xf32>
    %41 = vector.extract_strided_slice %7 {offsets = [0, 0, 160], sizes = [1, 8, 16], strides = [1, 1, 1]} : vector<1x8x384xf32> to vector<1x8x16xf32>
    %42 = vector.extract_strided_slice %7 {offsets = [0, 0, 288], sizes = [1, 8, 16], strides = [1, 1, 1]} : vector<1x8x384xf32> to vector<1x8x16xf32>
    "tpu.trace_start"() <{level = 10 : i32, message = "bqd,bkd->bqk"}> : () -> ()
    %cst_19 = arith.constant dense<0.000000e+00> : vector<1x8x8xf32>
    %43 = tpu.matmul %40, %41, %cst_19 {dimension_numbers = #tpu.dot_dimension_numbers<[2], [2], [1], [1], [0, 0, 0, 1, 1, 1], [0], [0]>} : vector<1x8x16xf32>, vector<1x8x16xf32>, vector<1x8x8xf32> -> vector<1x8x8xf32>
    "tpu.trace_stop"() : () -> ()
    %cst_20 = arith.constant dense<0xFF800000> : vector<1x8xf32>
    %44 = vector.multi_reduction <maximumf>, %43, %cst_20 [2] : vector<1x8x8xf32> to vector<1x8xf32>
    %45 = vector.shape_cast %44 : vector<1x8xf32> to vector<1x8x1xf32>
    %46 = vector.broadcast %45 : vector<1x8x1xf32> to vector<1x8x8xf32>
    %47 = arith.subf %43, %46 : vector<1x8x8xf32>
    %48 = math.exp %47 : vector<1x8x8xf32>
    %cst_21 = arith.constant dense<0.000000e+00> : vector<1x8xf32>
    %49 = vector.multi_reduction <add>, %48, %cst_21 [2] : vector<1x8x8xf32> to vector<1x8xf32>
    %50 = vector.shape_cast %49 : vector<1x8xf32> to vector<1x8x1xf32>
    "tpu.trace_start"() <{level = 10 : i32, message = "bqk,bkd->bqd"}> : () -> ()
    %cst_22 = arith.constant dense<0.000000e+00> : vector<1x8x16xf32>
    %51 = tpu.matmul %48, %42, %cst_22 {dimension_numbers = #tpu.dot_dimension_numbers<[2], [1], [1], [2], [0, 0, 0, 1, 1, 2], [0], [0]>} : vector<1x8x8xf32>, vector<1x8x16xf32>, vector<1x8x16xf32> -> vector<1x8x16xf32>
    "tpu.trace_stop"() : () -> ()
    %52 = tpu.reciprocal %50 {approx = true} : vector<1x8x1xf32> -> vector<1x8x1xf32>
    %53 = vector.broadcast %52 : vector<1x8x1xf32> to vector<1x8x16xf32>
    %54 = arith.mulf %51, %53 : vector<1x8x16xf32>
    %c0_23 = arith.constant 0 : index
    %c0_24 = arith.constant 0 : index
    %c32 = arith.constant 32 : index
    %55 = vector.load %arg7[%c0_23, %c0_24, %c32] : memref<1x8x128xf32, #tpu.memory_space<vmem>>, vector<1x8x16xf32>
    tpu.vector_store %arg7[%c0_23, %c0_24, %c32], %54 {strides = array<i32>} : memref<1x8x128xf32, #tpu.memory_space<vmem>>, vector<1x8x16xf32>,
    %56 = vector.extract_strided_slice %7 {offsets = [0, 0, 48], sizes = [1, 8, 16], strides = [1, 1, 1]} : vector<1x8x384xf32> to vector<1x8x16xf32>
    %57 = vector.extract_strided_slice %7 {offsets = [0, 0, 176], sizes = [1, 8, 16], strides = [1, 1, 1]} : vector<1x8x384xf32> to vector<1x8x16xf32>
    %58 = vector.extract_strided_slice %7 {offsets = [0, 0, 304], sizes = [1, 8, 16], strides = [1, 1, 1]} : vector<1x8x384xf32> to vector<1x8x16xf32>
    "tpu.trace_start"() <{level = 10 : i32, message = "bqd,bkd->bqk"}> : () -> ()
    %cst_25 = arith.constant dense<0.000000e+00> : vector<1x8x8xf32>
    %59 = tpu.matmul %56, %57, %cst_25 {dimension_numbers = #tpu.dot_dimension_numbers<[2], [2], [1], [1], [0, 0, 0, 1, 1, 1], [0], [0]>} : vector<1x8x16xf32>, vector<1x8x16xf32>, vector<1x8x8xf32> -> vector<1x8x8xf32>
    "tpu.trace_stop"() : () -> ()
    %cst_26 = arith.constant dense<0xFF800000> : vector<1x8xf32>
    %60 = vector.multi_reduction <maximumf>, %59, %cst_26 [2] : vector<1x8x8xf32> to vector<1x8xf32>
    %61 = vector.shape_cast %60 : vector<1x8xf32> to vector<1x8x1xf32>
    %62 = vector.broadcast %61 : vector<1x8x1xf32> to vector<1x8x8xf32>
    %63 = arith.subf %59, %62 : vector<1x8x8xf32>
    %64 = math.exp %63 : vector<1x8x8xf32>
    %cst_27 = arith.constant dense<0.000000e+00> : vector<1x8xf32>
    %65 = vector.multi_reduction <add>, %64, %cst_27 [2] : vector<1x8x8xf32> to vector<1x8xf32>
    %66 = vector.shape_cast %65 : vector<1x8xf32> to vector<1x8x1xf32>
    "tpu.trace_start"() <{level = 10 : i32, message = "bqk,bkd->bqd"}> : () -> ()
    %cst_28 = arith.constant dense<0.000000e+00> : vector<1x8x16xf32>
    %67 = tpu.matmul %64, %58, %cst_28 {dimension_numbers = #tpu.dot_dimension_numbers<[2], [1], [1], [2], [0, 0, 0, 1, 1, 2], [0], [0]>} : vector<1x8x8xf32>, vector<1x8x16xf32>, vector<1x8x16xf32> -> vector<1x8x16xf32>
    "tpu.trace_stop"() : () -> ()
    %68 = tpu.reciprocal %66 {approx = true} : vector<1x8x1xf32> -> vector<1x8x1xf32>
    %69 = vector.broadcast %68 : vector<1x8x1xf32> to vector<1x8x16xf32>
    %70 = arith.mulf %67, %69 : vector<1x8x16xf32>
    %c0_29 = arith.constant 0 : index
    %c0_30 = arith.constant 0 : index
    %c48 = arith.constant 48 : index
    %71 = vector.load %arg7[%c0_29, %c0_30, %c48] : memref<1x8x128xf32, #tpu.memory_space<vmem>>, vector<1x8x16xf32>
    tpu.vector_store %arg7[%c0_29, %c0_30, %c48], %70 {strides = array<i32>} : memref<1x8x128xf32, #tpu.memory_space<vmem>>, vector<1x8x16xf32>,
    %72 = vector.extract_strided_slice %7 {offsets = [0, 0, 64], sizes = [1, 8, 16], strides = [1, 1, 1]} : vector<1x8x384xf32> to vector<1x8x16xf32>
    %73 = vector.extract_strided_slice %7 {offsets = [0, 0, 192], sizes = [1, 8, 16], strides = [1, 1, 1]} : vector<1x8x384xf32> to vector<1x8x16xf32>
    %74 = vector.extract_strided_slice %7 {offsets = [0, 0, 320], sizes = [1, 8, 16], strides = [1, 1, 1]} : vector<1x8x384xf32> to vector<1x8x16xf32>
    "tpu.trace_start"() <{level = 10 : i32, message = "bqd,bkd->bqk"}> : () -> ()
    %cst_31 = arith.constant dense<0.000000e+00> : vector<1x8x8xf32>
    %75 = tpu.matmul %72, %73, %cst_31 {dimension_numbers = #tpu.dot_dimension_numbers<[2], [2], [1], [1], [0, 0, 0, 1, 1, 1], [0], [0]>} : vector<1x8x16xf32>, vector<1x8x16xf32>, vector<1x8x8xf32> -> vector<1x8x8xf32>
    "tpu.trace_stop"() : () -> ()
    %cst_32 = arith.constant dense<0xFF800000> : vector<1x8xf32>
    %76 = vector.multi_reduction <maximumf>, %75, %cst_32 [2] : vector<1x8x8xf32> to vector<1x8xf32>
    %77 = vector.shape_cast %76 : vector<1x8xf32> to vector<1x8x1xf32>
    %78 = vector.broadcast %77 : vector<1x8x1xf32> to vector<1x8x8xf32>
    %79 = arith.subf %75, %78 : vector<1x8x8xf32>
    %80 = math.exp %79 : vector<1x8x8xf32>
    %cst_33 = arith.constant dense<0.000000e+00> : vector<1x8xf32>
    %81 = vector.multi_reduction <add>, %80, %cst_33 [2] : vector<1x8x8xf32> to vector<1x8xf32>
    %82 = vector.shape_cast %81 : vector<1x8xf32> to vector<1x8x1xf32>
    "tpu.trace_start"() <{level = 10 : i32, message = "bqk,bkd->bqd"}> : () -> ()
    %cst_34 = arith.constant dense<0.000000e+00> : vector<1x8x16xf32>
    %83 = tpu.matmul %80, %74, %cst_34 {dimension_numbers = #tpu.dot_dimension_numbers<[2], [1], [1], [2], [0, 0, 0, 1, 1, 2], [0], [0]>} : vector<1x8x8xf32>, vector<1x8x16xf32>, vector<1x8x16xf32> -> vector<1x8x16xf32>
    "tpu.trace_stop"() : () -> ()
    %84 = tpu.reciprocal %82 {approx = true} : vector<1x8x1xf32> -> vector<1x8x1xf32>
    %85 = vector.broadcast %84 : vector<1x8x1xf32> to vector<1x8x16xf32>
    %86 = arith.mulf %83, %85 : vector<1x8x16xf32>
    %c0_35 = arith.constant 0 : index
    %c0_36 = arith.constant 0 : index
    %c64 = arith.constant 64 : index
    %87 = vector.load %arg7[%c0_35, %c0_36, %c64] : memref<1x8x128xf32, #tpu.memory_space<vmem>>, vector<1x8x16xf32>
    tpu.vector_store %arg7[%c0_35, %c0_36, %c64], %86 {strides = array<i32>} : memref<1x8x128xf32, #tpu.memory_space<vmem>>, vector<1x8x16xf32>,
    %88 = vector.extract_strided_slice %7 {offsets = [0, 0, 80], sizes = [1, 8, 16], strides = [1, 1, 1]} : vector<1x8x384xf32> to vector<1x8x16xf32>
    %89 = vector.extract_strided_slice %7 {offsets = [0, 0, 208], sizes = [1, 8, 16], strides = [1, 1, 1]} : vector<1x8x384xf32> to vector<1x8x16xf32>
    %90 = vector.extract_strided_slice %7 {offsets = [0, 0, 336], sizes = [1, 8, 16], strides = [1, 1, 1]} : vector<1x8x384xf32> to vector<1x8x16xf32>
    "tpu.trace_start"() <{level = 10 : i32, message = "bqd,bkd->bqk"}> : () -> ()
    %cst_37 = arith.constant dense<0.000000e+00> : vector<1x8x8xf32>
    %91 = tpu.matmul %88, %89, %cst_37 {dimension_numbers = #tpu.dot_dimension_numbers<[2], [2], [1], [1], [0, 0, 0, 1, 1, 1], [0], [0]>} : vector<1x8x16xf32>, vector<1x8x16xf32>, vector<1x8x8xf32> -> vector<1x8x8xf32>
    "tpu.trace_stop"() : () -> ()
    %cst_38 = arith.constant dense<0xFF800000> : vector<1x8xf32>
    %92 = vector.multi_reduction <maximumf>, %91, %cst_38 [2] : vector<1x8x8xf32> to vector<1x8xf32>
    %93 = vector.shape_cast %92 : vector<1x8xf32> to vector<1x8x1xf32>
    %94 = vector.broadcast %93 : vector<1x8x1xf32> to vector<1x8x8xf32>
    %95 = arith.subf %91, %94 : vector<1x8x8xf32>
    %96 = math.exp %95 : vector<1x8x8xf32>
    %cst_39 = arith.constant dense<0.000000e+00> : vector<1x8xf32>
    %97 = vector.multi_reduction <add>, %96, %cst_39 [2] : vector<1x8x8xf32> to vector<1x8xf32>
    %98 = vector.shape_cast %97 : vector<1x8xf32> to vector<1x8x1xf32>
    "tpu.trace_start"() <{level = 10 : i32, message = "bqk,bkd->bqd"}> : () -> ()
    %cst_40 = arith.constant dense<0.000000e+00> : vector<1x8x16xf32>
    %99 = tpu.matmul %96, %90, %cst_40 {dimension_numbers = #tpu.dot_dimension_numbers<[2], [1], [1], [2], [0, 0, 0, 1, 1, 2], [0], [0]>} : vector<1x8x8xf32>, vector<1x8x16xf32>, vector<1x8x16xf32> -> vector<1x8x16xf32>
    "tpu.trace_stop"() : () -> ()
    %100 = tpu.reciprocal %98 {approx = true} : vector<1x8x1xf32> -> vector<1x8x1xf32>
    %101 = vector.broadcast %100 : vector<1x8x1xf32> to vector<1x8x16xf32>
    %102 = arith.mulf %99, %101 : vector<1x8x16xf32>
    %c0_41 = arith.constant 0 : index
    %c0_42 = arith.constant 0 : index
    %c80 = arith.constant 80 : index
    %103 = vector.load %arg7[%c0_41, %c0_42, %c80] : memref<1x8x128xf32, #tpu.memory_space<vmem>>, vector<1x8x16xf32>
    tpu.vector_store %arg7[%c0_41, %c0_42, %c80], %102 {strides = array<i32>} : memref<1x8x128xf32, #tpu.memory_space<vmem>>, vector<1x8x16xf32>,
    %104 = vector.extract_strided_slice %7 {offsets = [0, 0, 96], sizes = [1, 8, 16], strides = [1, 1, 1]} : vector<1x8x384xf32> to vector<1x8x16xf32>
    %105 = vector.extract_strided_slice %7 {offsets = [0, 0, 224], sizes = [1, 8, 16], strides = [1, 1, 1]} : vector<1x8x384xf32> to vector<1x8x16xf32>
    %106 = vector.extract_strided_slice %7 {offsets = [0, 0, 352], sizes = [1, 8, 16], strides = [1, 1, 1]} : vector<1x8x384xf32> to vector<1x8x16xf32>
    "tpu.trace_start"() <{level = 10 : i32, message = "bqd,bkd->bqk"}> : () -> ()
    %cst_43 = arith.constant dense<0.000000e+00> : vector<1x8x8xf32>
    %107 = tpu.matmul %104, %105, %cst_43 {dimension_numbers = #tpu.dot_dimension_numbers<[2], [2], [1], [1], [0, 0, 0, 1, 1, 1], [0], [0]>} : vector<1x8x16xf32>, vector<1x8x16xf32>, vector<1x8x8xf32> -> vector<1x8x8xf32>
    "tpu.trace_stop"() : () -> ()
    %cst_44 = arith.constant dense<0xFF800000> : vector<1x8xf32>
    %108 = vector.multi_reduction <maximumf>, %107, %cst_44 [2] : vector<1x8x8xf32> to vector<1x8xf32>
    %109 = vector.shape_cast %108 : vector<1x8xf32> to vector<1x8x1xf32>
    %110 = vector.broadcast %109 : vector<1x8x1xf32> to vector<1x8x8xf32>
    %111 = arith.subf %107, %110 : vector<1x8x8xf32>
    %112 = math.exp %111 : vector<1x8x8xf32>
    %cst_45 = arith.constant dense<0.000000e+00> : vector<1x8xf32>
    %113 = vector.multi_reduction <add>, %112, %cst_45 [2] : vector<1x8x8xf32> to vector<1x8xf32>
    %114 = vector.shape_cast %113 : vector<1x8xf32> to vector<1x8x1xf32>
    "tpu.trace_start"() <{level = 10 : i32, message = "bqk,bkd->bqd"}> : () -> ()
    %cst_46 = arith.constant dense<0.000000e+00> : vector<1x8x16xf32>
    %115 = tpu.matmul %112, %106, %cst_46 {dimension_numbers = #tpu.dot_dimension_numbers<[2], [1], [1], [2], [0, 0, 0, 1, 1, 2], [0], [0]>} : vector<1x8x8xf32>, vector<1x8x16xf32>, vector<1x8x16xf32> -> vector<1x8x16xf32>
    "tpu.trace_stop"() : () -> ()
    %116 = tpu.reciprocal %114 {approx = true} : vector<1x8x1xf32> -> vector<1x8x1xf32>
    %117 = vector.broadcast %116 : vector<1x8x1xf32> to vector<1x8x16xf32>
    %118 = arith.mulf %115, %117 : vector<1x8x16xf32>
    %c0_47 = arith.constant 0 : index
    %c0_48 = arith.constant 0 : index
    %c96 = arith.constant 96 : index
    %119 = vector.load %arg7[%c0_47, %c0_48, %c96] : memref<1x8x128xf32, #tpu.memory_space<vmem>>, vector<1x8x16xf32>
    tpu.vector_store %arg7[%c0_47, %c0_48, %c96], %118 {strides = array<i32>} : memref<1x8x128xf32, #tpu.memory_space<vmem>>, vector<1x8x16xf32>,
    %120 = vector.extract_strided_slice %7 {offsets = [0, 0, 112], sizes = [1, 8, 16], strides = [1, 1, 1]} : vector<1x8x384xf32> to vector<1x8x16xf32>
    %121 = vector.extract_strided_slice %7 {offsets = [0, 0, 240], sizes = [1, 8, 16], strides = [1, 1, 1]} : vector<1x8x384xf32> to vector<1x8x16xf32>
    %122 = vector.extract_strided_slice %7 {offsets = [0, 0, 368], sizes = [1, 8, 16], strides = [1, 1, 1]} : vector<1x8x384xf32> to vector<1x8x16xf32>
    "tpu.trace_start"() <{level = 10 : i32, message = "bqd,bkd->bqk"}> : () -> ()
    %cst_49 = arith.constant dense<0.000000e+00> : vector<1x8x8xf32>
    %123 = tpu.matmul %120, %121, %cst_49 {dimension_numbers = #tpu.dot_dimension_numbers<[2], [2], [1], [1], [0, 0, 0, 1, 1, 1], [0], [0]>} : vector<1x8x16xf32>, vector<1x8x16xf32>, vector<1x8x8xf32> -> vector<1x8x8xf32>
    "tpu.trace_stop"() : () -> ()
    %cst_50 = arith.constant dense<0xFF800000> : vector<1x8xf32>
    %124 = vector.multi_reduction <maximumf>, %123, %cst_50 [2] : vector<1x8x8xf32> to vector<1x8xf32>
    %125 = vector.shape_cast %124 : vector<1x8xf32> to vector<1x8x1xf32>
    %126 = vector.broadcast %125 : vector<1x8x1xf32> to vector<1x8x8xf32>
    %127 = arith.subf %123, %126 : vector<1x8x8xf32>
    %128 = math.exp %127 : vector<1x8x8xf32>
    %cst_51 = arith.constant dense<0.000000e+00> : vector<1x8xf32>
    %129 = vector.multi_reduction <add>, %128, %cst_51 [2] : vector<1x8x8xf32> to vector<1x8xf32>
    %130 = vector.shape_cast %129 : vector<1x8xf32> to vector<1x8x1xf32>
    "tpu.trace_start"() <{level = 10 : i32, message = "bqk,bkd->bqd"}> : () -> ()
    %cst_52 = arith.constant dense<0.000000e+00> : vector<1x8x16xf32>
    %131 = tpu.matmul %128, %122, %cst_52 {dimension_numbers = #tpu.dot_dimension_numbers<[2], [1], [1], [2], [0, 0, 0, 1, 1, 2], [0], [0]>} : vector<1x8x8xf32>, vector<1x8x16xf32>, vector<1x8x16xf32> -> vector<1x8x16xf32>
    "tpu.trace_stop"() : () -> ()
    %132 = tpu.reciprocal %130 {approx = true} : vector<1x8x1xf32> -> vector<1x8x1xf32>
    %133 = vector.broadcast %132 : vector<1x8x1xf32> to vector<1x8x16xf32>
    %134 = arith.mulf %131, %133 : vector<1x8x16xf32>
    %c0_53 = arith.constant 0 : index
    %c0_54 = arith.constant 0 : index
    %c112 = arith.constant 112 : index
    %135 = vector.load %arg7[%c0_53, %c0_54, %c112] : memref<1x8x128xf32, #tpu.memory_space<vmem>>, vector<1x8x16xf32>
    tpu.vector_store %arg7[%c0_53, %c0_54, %c112], %134 {strides = array<i32>} : memref<1x8x128xf32, #tpu.memory_space<vmem>>, vector<1x8x16xf32>,
    %c0_55 = arith.constant 0 : index
    %c0_56 = arith.constant 0 : index
    %c0_57 = arith.constant 0 : index
    %136 = vector.load %arg7[%c0_55, %c0_56, %c0_57] : memref<1x8x128xf32, #tpu.memory_space<vmem>>, vector<1x8x128xf32>
    %137 = vector.shape_cast %136 : vector<1x8x128xf32> to vector<8x128xf32>
    %c0_58 = arith.constant 0 : index
    %c0_59 = arith.constant 0 : index
    %138 = vector.load %arg4[%c0_58, %c0_59] : memref<128x128xf32, #tpu.memory_space<vmem>>, vector<128x128xf32>
    %cst_60 = arith.constant dense<0.000000e+00> : vector<8x128xf32>
    %139 = tpu.matmul %137, %138, %cst_60 {dimension_numbers = #tpu.dot_dimension_numbers<[1], [0], [0], [1], [0, 0, 1, 1], [], []>} : vector<8x128xf32>, vector<128x128xf32>, vector<8x128xf32> -> vector<8x128xf32>
    %c0_61 = arith.constant 0 : index
    %c0_62 = arith.constant 0 : index
    %140 = vector.load %arg5[%c0_61, %c0_62] : memref<1x128xf32, #tpu.memory_space<vmem>>, vector<1x128xf32>
    %141 = vector.broadcast %140 : vector<1x128xf32> to vector<8x128xf32>
    %142 = arith.addf %139, %141 : vector<8x128xf32>
    %143 = vector.shape_cast %142 : vector<8x128xf32> to vector<1x8x128xf32>
    %c0_63 = arith.constant 0 : index
    %c0_64 = arith.constant 0 : index
    %c0_65 = arith.constant 0 : index
    %144 = vector.load %arg6[%c0_63, %c0_64, %c0_65] : memref<1x8x128xf32, #tpu.memory_space<vmem>>, vector<1x8x128xf32>
    tpu.vector_store %arg6[%c0_63, %c0_64, %c0_65], %143 {strides = array<i32>} : memref<1x8x128xf32, #tpu.memory_space<vmem>>, vector<1x8x128xf32>,
    return
  }
  func.func @transform_0(%arg0: i32) -> (i32, i32, i32) {
    %c0_i32 = arith.constant 0 : i32
    %c0_i32_0 = arith.constant 0 : i32
    %c0_i32_1 = arith.constant 0 : i32
    return %arg0, %c0_i32, %c0_i32_0 : i32, i32, i32
  }
  func.func @transform_1(%arg0: i32) -> (i32, i32) {
    %c0_i32 = arith.constant 0 : i32
    %c0_i32_0 = arith.constant 0 : i32
    %c0_i32_1 = arith.constant 0 : i32
    return %c0_i32, %c0_i32_0 : i32, i32
  }
  func.func @transform_2(%arg0: i32) -> (i32, i32) {
    %c0_i32 = arith.constant 0 : i32
    %c0_i32_0 = arith.constant 0 : i32
    %c0_i32_1 = arith.constant 0 : i32
    return %c0_i32, %c0_i32_0 : i32, i32
  }
  func.func @transform_3(%arg0: i32) -> (i32, i32) {
    %c0_i32 = arith.constant 0 : i32
    %c0_i32_0 = arith.constant 0 : i32
    %c0_i32_1 = arith.constant 0 : i32
    return %c0_i32, %c0_i32_0 : i32, i32
  }
  func.func @transform_4(%arg0: i32) -> (i32, i32) {
    %c0_i32 = arith.constant 0 : i32
    %c0_i32_0 = arith.constant 0 : i32
    %c0_i32_1 = arith.constant 0 : i32
    return %c0_i32, %c0_i32_0 : i32, i32
  }
  func.func @transform_5(%arg0: i32) -> (i32, i32, i32) {
    %c0_i32 = arith.constant 0 : i32
    %c0_i32_0 = arith.constant 0 : i32
    %c0_i32_1 = arith.constant 0 : i32
    return %arg0, %c0_i32, %c0_i32_0 : i32, i32, i32
  }
}

</mosaic_0001>

<bundles_post_ra>
// kernel: msa_forward.1
= control target key start
LH: loop header
LB: loop body
LE: loop exit
PB: predicated region body
PF: predicated region fallthrough
CT: control target
= control target key end

     0   :  { %10 = vsyncpa [#allocation4], 0  ;;  %s1790_s0 = inlined_call_operand.hbm [shape: f32[2,8,128], index: 0, kind: input, shape index: {}]   ;;  %s1791_s1 = inlined_call_operand.hbm [shape: f32[128,384], index: 1, kind: input, shape index: {}]   ;;  %s1792_s2 = inlined_call_operand.hbm [shape: f32[1,384], index: 2, kind: input, shape index: {}]   ;;  %s1793_s3 = inlined_call_operand.hbm [shape: f32[128,128], index: 3, kind: input, shape index: {}]   ;;  %s1794_s4 = inlined_call_operand.vmem [shape: f32[1,128], index: 4, kind: input, shape index: {}]   ;;  %s1795_s5 = inlined_call_operand.hbm [shape: f32[2,8,128], index: 5, kind: output, shape index: {}]  }
   0x1   :  { %12 = vsyncpa [#allocation4 + $0x1], 0 }
   0x2   :  { %13 = vsyncpa [#allocation7], 0 }
   0x3   :  { %14 = vsyncpa [#allocation10], 0 }
   0x4   :  { %15 = vsyncpa [#allocation5], 0 }
   0x5   :  { %17 = vsyncpa [#allocation5 + $0x1], 0  ;;  %s1528_s18 = smov 0   ;;  %s1530_s19 = smov 0  }
   0x6   :  { %s1532_s20 = smov 0   ;;  %s1534_s21 = smov 0  }
   0x7 LB: > { %s175_s24 = sshll.u32 %s1791_s1, 4  ;;  %s1552_s25 = sadd.s32 4294967295, %s1482_s21   ;;  %s1482_s21 = sphi %s1534_s21, %s1806_s21   ;;  %s1478_s20 = sphi %s1532_s20, %s1805_s20   ;;  %s1474_s19 = sphi %s1530_s19, %s1804_s19   ;;  %s1470_s18 = sphi %s1528_s18, %s1803_s18   ;;  %s176_s24 = int_to_ptr.hbm [resolvable:$true] %s175_s24 }
   0x8   : > { %p1126_p0 = scmp.ge.s32.totalorder %s1482_s21, 1  ;;  %p44_p1 = scmp.eq.s32.totalorder %s1552_s25, 0 }
   0x9   : > { %p164_p2 = scmp.lt.s32.totalorder %s1482_s21, 3  ;;  %s1484_s27 = smov [#allocation6]  }
   0xa   : > { %s177_s28 = sshll.u32 %s1484_s27, 4  ;;  %s190_s6 = sshll.u32 %s1792_s2, 4  ;;  %s178_s28 = int_to_ptr.vmem [resolvable:$true] %s177_s28  ;;  %s191_s6 = int_to_ptr.hbm [resolvable:$true] %s190_s6 }
   0xb   : > { %p1557_p3 = pnand %p1126_p0, %p164_p2  ;;  %s201_s10 = sshll.u32 %s1793_s3, 4  ;;  %s202_s10 = int_to_ptr.hbm [resolvable:$true] %s201_s10 }
   0xc   : > { %s1485_s11 = smov [#allocation8]   ;;  %s1486_s13 = smov 384  }
   0xd   : > { %p1183_p4 = pneg %p1557_p3  ;;  %s192_s12 = sshll.u32 %s1485_s11, 4  ;;  %s193_s12 = int_to_ptr.vmem [resolvable:$true] %s192_s12 }
   0xe   : > { %s1487_s14 = smov 24   ;;  %s1488_s15 = smov [#allocation9]  }
   0xf   : > { %p1569_p6 = pnand %p1183_p4, %p44_p1  ;;  %s203_s16 = sshll.u32 %s1488_s15, 4  ;;  %s204_s16 = int_to_ptr.vmem [resolvable:$true] %s203_s16 }
  0x10   : > { %s1489_s17 = smov 128   ;;  %s1490_s22 = smov 8  }
  0x11   : > { %1186 = dma.hbm_to_vmem [thread:$0]  (!%p1569_p6), %s176_s24, 6144, %s178_s28, [#allocation7], %s1486_s13, %s1486_s13, %s1487_s14  }
  0x12   : > { %1189 = dma.hbm_to_vmem [thread:$0]  (!%p1569_p6), %s191_s6, 48, %s193_s12, [#allocation7]  }
  0x13   : > { %1192 = dma.hbm_to_vmem [thread:$0]  (!%p1569_p6), %s202_s10, 2048, %s204_s16, [#allocation10], %s1489_s17, %s1489_s17, %s1490_s22  }
  0x14   : > { %s1125_s23 = sadd.s32 4294967294, %s1482_s21   ;;  %s1584_s24 = sadd.s32 1, %s1482_s21  }
  0x15   : > { %s30_s27 = sadd.s32 1, %s1478_s20  ;;  %s27_s28 = ssub.s32 %s1482_s21, %s1584_s24 }
  0x16   : > { %p37_p7 = scmp.ne.s32.totalorder %s1478_s20, %s1474_s19  ;;  %p28_p8 = scmp.eq.s32.totalorder %s27_s28, 0 }
  0x17   : > { %p38_p9 = scmp.eq.s32.totalorder %s1482_s21, 0  ;;  %p43_p10 = scmp.ne.s32.totalorder %s1474_s19, %s1470_s18 }
  0x18   : > { %p151_p11 = scmp.eq.s32.totalorder %s1552_s25, 1  ;;  %p157_p0 = scmp.eq.s32.totalorder %s1125_s23, 1 }
  0x19   : > { %s1596_s29 = scalar_select %p28_p8, %s1478_s20, %s30_s27  }
  0x1a   : > { %p1600_p12 = por %p44_p1, %p43_p10  ;;  %p1604_p13 = por %p151_p11, %p37_p7 }
  0x1b   : > { %p39_p2 = por %p38_p9, %p37_p7  ;;  %s220_s7 = sand.u32 1, %s1478_s20  }
  0x1c   : > { %p1609_p4 = por %p157_p0, %p43_p10  ;;  %p1204_p6 = scmp.lt.s32.totalorder %s1482_s21, 2 }
  0x1d   : > { %s1131_s9 = sshll.u32 %s220_s7, 3  ;;  %s1132_s10 = sshll.u32 %s1482_s21, 3 }
  0x1e   : > { %s228_s13 = scalar_lea.hbm %s1790_s0, %s1132_s10  ;;  %s224_s15 = scalar_lea.vmem [#allocation3], %s1131_s9 }
  0x1f   : > { %s230_s14 = sshll.u32 %s228_s13, 4  ;;  %s232_s16 = sshll.u32 %s224_s15, 4  ;;  %s231_s14 = int_to_ptr.hbm [resolvable:$true] %s230_s14  ;;  %s233_s16 = int_to_ptr.vmem [resolvable:$true] %s232_s16 }
  0x20   : > { %p1618_p8 = pnand %p1204_p6, %p39_p2  ;;  %s221_s22 = scalar_lea.sflag [#allocation4], %s220_s7 }
  0x21   : > { %s1378_s23 = sshra.s32 %s231_s14, 4  ;;  %s1385_s9 = scalar_lea.hbm %s1790_s0, 16  ;;  %s1379_s23 = int_to_ptr.hbm [resolvable:$true] %s1378_s23 }
  0x22   : > { %s1380_s27 = scalar_lea.hbm %s1379_s23, 8  ;;  %p1382_p9 = pneg %p1618_p8 }
  0x23   : > { %p1381_p7 = scmp.ne.s32.totalorder %s1379_s23, %s1380_s27  ;;  %p1386_p0 = scmp.lt.s32.totalorder %s1379_s23, %s1790_s0 }
  0x24   : > { %p1387_p2 = scmp.lt.s32.totalorder %s1385_s9, %s1380_s27 }
  0x25   : > { %p1383_p10 = pnand %p1382_p9, %p1381_p7 }
  0x26   : > { %p1388_p6 = por %p1387_p2, %p1386_p0 }
  0x27   : > { %p1384_p11 = pneg %p1383_p10 }
  0x29   : > { %p1389_p5 = pnand %p1388_p6, %p1384_p11 }
  0x2b   : > { %1392 = shalt.err (!%p1389_p5)
}
  0x2c   : > { %1196 = dma.hbm_to_vmem [thread:$0]  (!%p1618_p8), %s231_s14, 128, %s233_s16, %s221_s22  }
  0x2d   : > { %241 = sbr.rel (%p1557_p3) target bundleno = 1279 (0x4ff), region = 40  ;;  %s1635_s7 = sand.u32 (!%p1557_p3), 1, %s1474_s19  }
  0x2e   : > { %s1134_s13 = sshll.u32 (!%p1557_p3), %s1635_s7, 3  ;;  %s244_s15 = scalar_lea.sflag (!%p1557_p3), [#allocation4], %s1635_s7 }
  0x2f   : > { %s1641_s23 = scalar_lea.vmem (!%p1557_p3), [#allocation3], %s1134_s13 }
  0x32   : > { %1453 = dma.done.wait (%p1600_p12), %s244_s15, 128  }
  0x33   : > { %1455 = vsyncadd (%p1600_p12), %s244_s15, 4294967168 }
  0x34   : > { %1457 = dma.done.wait (%p44_p1), [#allocation7], 6192  }
  0x35   : > { %1459 = vsyncadd (%p44_p1), [#allocation7], 4294961104 }
  0x36   : > { %1461 = dma.done.wait (%p44_p1), [#allocation10], 2048  }
  0x37   : > { %1463 = vsyncadd (%p44_p1), [#allocation10], 4294965248  ;;  %v337_v0 = vld [vmem:[#allocation6 + $0x170] sm:$0xff]  ;;  %v334_v1 = vld [vmem:[#allocation6 + $0x158] sm:$0xff]  ;;  %vm407_vm0 = vcmask 130048   ;;  %s1491_s26 = smov 32  }
  0x38   : > { %v338_v2 = vld [vmem:[#allocation6 + $0x178] sm:$0xff]  ;;  %367 = vmatpush.msra.mxu1 %v337_v0  ;;  %v336_v3 = vld [vmem:[#allocation6 + $0x168] sm:$0xff]  ;;  %v335_v4 = vld [vmem:[#allocation6 + $0x160] sm:$0xff]  ;;  %s1492_s30 = smov 96   ;;  %s1493_s14 = smov 112   ;;  %vm434_vm1 = vcmask 64512  }
  0x39   : > { %387 = vmatpush.msra.mxu2 %v338_v2  ;;  %347 = vmatpush.msra.mxu0 %v336_v3  ;;  %v331_v5 = vld [vmem:[#allocation6 + $0x140] sm:$0xff]  ;;  %v333_v6 = vld [vmem:[#allocation6 + $0x150] sm:$0xff]  ;;  %v332_v7 = vld [vmem:[#allocation6 + $0x148] sm:$0xff]  ;;  %s1494_s16 = smov 80   ;;  %s1495_s17 = smov 48   ;;  %vm540_vm2 = vcmask 261248  }
  0x3a   : > { %368 = vmatpush.msra.mxu1 %v334_v1  ;;  %v330_v8 = vld [vmem:[#allocation6 + $0x138] sm:$0xff]  ;;  %v328_v9 = vld [vmem:[#allocation6 + $0x128] sm:$0xff]  ;;  %v329_v10 = vld [vmem:[#allocation6 + $0x130] sm:$0xff]  ;;  %s1496_s22 = smov 64   ;;  %s1497_s27 = smov 16   ;;  %vm611_vm3 = vcmask 392448  }
  0x3b   : > { %388 = vmatpush.msra.mxu2 %v335_v4  ;;  %348 = vmatpush.msra.mxu0 %v333_v6  ;;  %v327_v11 = vld [vmem:[#allocation6 + $0x120] sm:$0xff]  ;;  %v325_v12 = vld [vmem:[#allocation6 + $0x110] sm:$0xff]  ;;  %v326_v13 = vld [vmem:[#allocation6 + $0x118] sm:$0xff]  ;;  %vm682_vm4 = vcmask 523648   ;;  %vm753_vm5 = vcmask 654848   ;;  %vm824_vm6 = vcmask 786048  }
  0x3c   : > { %369 = vmatpush.msra.mxu1 %v331_v5  ;;  %v324_v14 = vld [vmem:[#allocation6 + $0x108] sm:$0xff]  ;;  %v322_v15 = vld [vmem:[#allocation6 + $0xf8] sm:$0xff]  ;;  %v323_v16 = vld [vmem:[#allocation6 + $0x100] sm:$0xff]  ;;  %vm895_vm7 = vcmask 917248   ;;  %vm966_vm8 = vcmask 1048448   ;;  %s1164_s28 = sshll.u32 %s1552_s25, 3 }
  0x3d   : > { %389 = vmatpush.msra.mxu2 %v332_v7  ;;  %349 = vmatpush.msra.mxu0 %v330_v8  ;;  %v321_v17 = vld [vmem:[#allocation6 + $0xf0] sm:$0xff]  ;;  %v319_v18 = vld [vmem:[#allocation6 + $0xe0] sm:$0xff]  ;;  %v320_v19 = vld [vmem:[#allocation6 + $0xe8] sm:$0xff]  ;;  %s1021_s11 = scalar_lea.hbm %s1795_s5, %s1164_s28 }
  0x3e   : > { %370 = vmatpush.msra.mxu1 %v328_v9  ;;  %v318_v20 = vld [vmem:[#allocation6 + $0xd8] sm:$0xff]  ;;  %v316_v21 = vld [vmem:[#allocation6 + $0xc8] sm:$0xff]  ;;  %v317_v22 = vld [vmem:[#allocation6 + $0xd0] sm:$0xff] }
  0x3f   : > { %390 = vmatpush.msra.mxu2 %v329_v10  ;;  %350 = vmatpush.msra.mxu0 %v327_v11  ;;  %v315_v23 = vld [vmem:[#allocation6 + $0xc0] sm:$0xff]  ;;  %v313_v24 = vld [vmem:[#allocation6 + $0xb0] sm:$0xff]  ;;  %v314_v25 = vld [vmem:[#allocation6 + $0xb8] sm:$0xff] }
  0x40   : > { %371 = vmatpush.msra.mxu1 %v325_v12  ;;  %v312_v26 = vld [vmem:[#allocation6 + $0xa8] sm:$0xff]  ;;  %v310_v27 = vld [vmem:[#allocation6 + $0x98] sm:$0xff]  ;;  %v311_v28 = vld [vmem:[#allocation6 + $0xa0] sm:$0xff] }
  0x41   : > { %391 = vmatpush.msra.mxu2 %v326_v13  ;;  %351 = vmatpush.msra.mxu0 %v324_v14  ;;  %v309_v29 = vld [vmem:[#allocation6 + $0x90] sm:$0xff]  ;;  %v307_v30 = vld [vmem:[#allocation6 + $0x80] sm:$0xff]  ;;  %v308_v31 = vld [vmem:[#allocation6 + $0x88] sm:$0xff] }
  0x42   : > { %372 = vmatpush.msra.mxu1 %v322_v15  ;;  %v306_v32 = vld [vmem:[#allocation6 + $0x78] sm:$0xff]  ;;  %v304_v33 = vld [vmem:[#allocation6 + $0x68] sm:$0xff]  ;;  %v305_v34 = vld [vmem:[#allocation6 + $0x70] sm:$0xff] }
  0x43   : > { %392 = vmatpush.msra.mxu2 %v323_v16  ;;  %352 = vmatpush.msra.mxu0 %v321_v17  ;;  %v303_v35 = vld [vmem:[#allocation6 + $0x60] sm:$0xff]  ;;  %v301_v36 = vld [vmem:[#allocation6 + $0x50] sm:$0xff]  ;;  %v302_v37 = vld [vmem:[#allocation6 + $0x58] sm:$0xff] }
  0x44   : > { %373 = vmatpush.msra.mxu1 %v319_v18  ;;  %v300_v38 = vld [vmem:[#allocation6 + $0x48] sm:$0xff]  ;;  %v298_v39 = vld [vmem:[#allocation6 + $0x38] sm:$0xff]  ;;  %v299_v40 = vld [vmem:[#allocation6 + $0x40] sm:$0xff] }
  0x45   : > { %393 = vmatpush.msra.mxu2 %v320_v19  ;;  %353 = vmatpush.msra.mxu0 %v318_v20  ;;  %v297_v41 = vld [vmem:[#allocation6 + $0x30] sm:$0xff]  ;;  %v295_v42 = vld [vmem:[#allocation6 + $0x20] sm:$0xff]  ;;  %v296_v43 = vld [vmem:[#allocation6 + $0x28] sm:$0xff] }
  0x46   : > { %374 = vmatpush.msra.mxu1 %v316_v21  ;;  %v294_v44 = vld [vmem:[#allocation6 + $0x18] sm:$0xff]  ;;  %v292_v45 = vld [vmem:[#allocation6 + $0x8] sm:$0xff]  ;;  %v293_v46 = vld [vmem:[#allocation6 + $0x10] sm:$0xff] }
  0x47   : > { %394 = vmatpush.msra.mxu2 %v317_v22  ;;  %354 = vmatpush.msra.mxu0 %v315_v23  ;;  %v290_v47 = vld [vmem:[%s1641_s23] sm:$0xff]  ;;  %v291_v48 = vld [vmem:[#allocation6] sm:$0xff]  ;;  %s289_s23 = scalar_lea.vmem [#allocation11], %s1134_s13 }
  0x48   : > { %375 = vmatpush.msra.mxu1 %v313_v24  ;;  %v339_v49 = vld [vmem:[#allocation8] sm:$0x7] }
  0x49   : > { %395 = vmatpush.msra.mxu2 %v314_v25  ;;  %355 = vmatpush.msra.mxu0 %v312_v26  ;;  %v342_v50 = vperm.slane %v339_v49, 1  ;;  %v341_v51 = vperm.slane %v339_v49, 0  ;;  %v343_v56 = vperm.slane %v339_v49, 2 }
  0x4a   : > { %376 = vmatpush.msra.mxu1 %v310_v27 }
  0x4b   : > { %396 = vmatpush.msra.mxu2 %v311_v28  ;;  %356 = vmatpush.msra.mxu0 %v309_v29 }
  0x4c   : > { %377 = vmatpush.msra.mxu1 %v307_v30 }
  0x4d   : > { %397 = vmatpush.msra.mxu2 %v308_v31  ;;  %357 = vmatpush.msra.mxu0 %v306_v32 }
  0x4e   : > { %378 = vmatpush.msra.mxu1 %v304_v33 }
  0x4f   : > { %398 = vmatpush.msra.mxu2 %v305_v34  ;;  %358 = vmatpush.msra.mxu0 %v303_v35 }
  0x50   : > { %379 = vmatpush.msra.mxu1 %v301_v36 }
  0x51   : > { %399 = vmatpush.msra.mxu2 %v302_v37  ;;  %359 = vmatpush.msra.mxu0 %v300_v38 }
  0x52   : > { %380 = vmatpush.msra.mxu1 %v298_v39 }
  0x53   : > { %400 = vmatpush.msra.mxu2 %v299_v40  ;;  %360 = vmatpush.msra.mxu0 %v297_v41 }
  0x54   : > { %381 = vmatpush.msra.mxu1 %v295_v42 }
  0x55   : > { %401 = vmatpush.msra.mxu2 %v296_v43  ;;  %361 = vmatpush.msra.mxu0 %v294_v44 }
  0x56   : > { %382 = vmatpush.msra.mxu1 %v292_v45 }
  0x57   : > { %402 = vmatpush.msra.mxu2 %v293_v46  ;;  %383 = vmatmul.f32.vlgmr.msra.gmra.mxu1 %v290_v47 }
  0x58   : > { %362 = vmatpush.msra.mxu0 %v291_v48  ;;  %403 = vmatmul.f32.vlgmr.msra.gmra.mxu2 %v290_v47 }
  0x59   : > { %363 = vmatmul.f32.vlgmr.msra.gmra.mxu0 %v290_v47 }
  0xd4   : > { %v384_v52 = vpop.f32.mrf.mxu1 }
  0xd5   : > { %v385_v53 = vadd.f32 %v384_v52, %v342_v50 }
  0xd6   : > { %v364_v54 = vpop.f32.mrf.mxu0 }
  0xd7   : > { %828 = vrot.lane.b32.xlu1 %v385_v53, %s1491_s26  ;;  %544 = vrot.lane.b32.xlu2 %v385_v53, %s1492_s30  ;;  %v1658_v55 = vadd.f32 %v364_v54, %v341_v51 }
  0xd8   : > { %472 = vrot.lane.b32.xlu0 %v385_v53, %s1493_s14  ;;  %1139 = vmatpush.xpose.msk.msrb.mxu0 %vm407_vm0, %v385_v53 }
  0xdb   : > { %1140 = vmatmul.msk.f32.vlgmr.msrb.gmra.mxu0 %vm407_vm0, %v1658_v55  ;;  %v404_v57 = vpop.f32.mrf.mxu2 }
  0xdc   : > { %v1664_v58 = vadd.f32 %v404_v57, %v343_v56 }
  0xde   : > { %462 = vmatpush.msrb.mxu2 %v1664_v58 }
  0xdf   : > { %508 = vrot.lane.b32.xlu1 %v1664_v58, %s1493_s14  ;;  %615 = vrot.lane.b32.xlu2 %v385_v53, %s1494_s16 }
  0xe0   : > { %470 = vrot.lane.b32.xlu0 %v1658_v55, %s1493_s14 }
  0xe7   : > { %613 = vrot.lane.b32.xlu2 %v1658_v55, %s1494_s16 }
  0xe8   : > { %542 = vrot.lane.b32.xlu0 %v1658_v55, %s1492_s30 }
  0xef   : > { %757 = vrot.lane.b32.xlu2 %v385_v53, %s1495_s17 }
  0xf0   : > { %686 = vrot.lane.b32.xlu0 %v385_v53, %s1496_s22 }
  0xf7   : > { %755 = vrot.lane.b32.xlu2 %v1658_v55, %s1495_s17 }
  0xf8   : > { %684 = vrot.lane.b32.xlu0 %v1658_v55, %s1496_s22 }
  0xff   : > { %826 = vrot.lane.b32.xlu2 %v1658_v55, %s1491_s26 }
 0x100   : > { %899 = vrot.lane.b32.xlu0 %v385_v53, %s1497_s27 }
 0x107   : > { %579 = vrot.lane.b32.xlu2 %v1664_v58, %s1492_s30 }
 0x131   : > { %v545_v59 = vpop.permute.xlu2 %544 }
 0x139   : > { %v616_v60 = vpop.permute.xlu2 %615 }
 0x141   : > { %v614_v61 = vpop.permute.xlu2 %613 }
 0x149   : > { %v1687_v62 = vpop.permute.xlu1 %828  ;;  %v758_v2 = vpop.permute.xlu2 %757 }
 0x14a   : > { %v473_v63 = vpop.permute.xlu0 %472 }
 0x14b   : > { %1142 = vmatpush.xpose.msk.msrb.mxu1 %vm407_vm0, %v473_v63 }
 0x14f   : > { %1148 = vmatpush.xpose.msk.msra.mxu1 %vm407_vm0, %v616_v60 }
 0x151   : > { %v509_v0 = vpop.permute.xlu1 %508  ;;  %v756_v6 = vpop.permute.xlu2 %755 }
 0x152   : > { %v471_v1 = vpop.permute.xlu0 %470  ;;  %529 = vmatpush.msra.mxu3 %v509_v0 }
 0x153   : > { %1143 = vmatmul.msk.f32.vlgmr.msrb.gmra.mxu1 %vm407_vm0, %v471_v1 }
 0x154   : > { %1145 = vmatpush.xpose.msk.msrb.mxu3 %vm407_vm0, %v545_v59  ;;  %1154 = vmatpush.xpose.msk.msrb.mxu1 %vm407_vm0, %v758_v2 }
 0x158   : > { %v431_v3 = vpop.f32.mrf.mxu0 }
 0x159   : > { %v435_v4 = vsel %vm434_vm1, %v431_v3, -inf  ;;  %v827_v15 = vpop.permute.xlu2 %826 }
 0x15a   : > { %v543_v5 = vpop.permute.xlu0 %542  ;;  %436 = vmax.xlane.f32.xlu0 %v435_v4 }
 0x15b   : > { %1149 = vmatmul.msk.f32.vlgmr.msra.gmra.mxu1 %vm407_vm0, %v614_v61 }
 0x161   : > { %v580_v19 = vpop.permute.xlu2 %579 }
 0x162   : > { %v687_v7 = vpop.permute.xlu0 %686  ;;  %600 = vmatpush.msra.mxu0 %v580_v19 }
 0x163   : > { %1155 = vmatmul.msk.f32.vlgmr.msrb.gmra.mxu1 %vm407_vm0, %v756_v6 }
 0x16a   : > { %v685_v8 = vpop.permute.xlu0 %684 }
 0x16e   : > { %650 = vrot.lane.b32.xlu0 %v1664_v58, %s1494_s16 }
 0x172   : > { %v900_v9 = vpop.permute.xlu0 %899 }
 0x173   : > { %1160 = vmatpush.xpose.msk.msra.mxu1 %vm407_vm0, %v900_v9 }
 0x1cd   : > { %v437_v10 = vpop.xlane.xlu0 %436 }
 0x1ce   : > { %v438_v11 = vsub.f32 %v431_v3, %v437_v10 }
 0x1d0   : > { %v439_v12 = vmul.f32 1.442695, %v438_v11  ;;  %v495_v13 = vpop.f32.mrf.mxu1 }
 0x1d1   : > { %v498_v14 = vsel %vm434_vm1, %v495_v13, -inf }
 0x1d2   : > { %1256 = vpow2.f32 %v439_v12  ;;  %499 = vmax.xlane.f32.xlu1 %v498_v14 }
 0x1d8   : > { %v1701_v16 = vpop.eup %1256  ;;  %v638_v17 = vpop.f32.mrf.mxu1 }
 0x1d9   : > { %1141 = vmatmul.msk.f32.vlgmr.msrb.gmra.mxu2 %vm434_vm1, %v1701_v16  ;;  %v641_v18 = vsel %vm434_vm1, %v638_v17, -inf }
 0x1da   : > { %642 = vmax.xlane.f32.xlu2 %v641_v18 }
 0x1e0   : > { %v780_v20 = vpop.f32.mrf.mxu1  ;;  %v651_v22 = vpop.permute.xlu0 %650 }
 0x1e1   : > { %v783_v21 = vsel %vm434_vm1, %v780_v20, -inf  ;;  %671 = vmatpush.msra.mxu2 %v651_v22 }
 0x1e2   : > { %784 = vmax.xlane.f32.xlu2 %v783_v21 }
 0x1eb   : > { %897 = vrot.lane.b32.xlu1 %v1658_v55, %s1497_s27 }
 0x1f3   : > { %792 = vrot.lane.b32.xlu1 %v1664_v58, %s1495_s17 }
 0x1fa   : > { %721 = vrot.lane.b32.xlu2 %v1664_v58, %s1496_s22 }
 0x202   : > { %934 = vrot.lane.b32.xlu2 %v1664_v58, %s1497_s27 }
 0x245   : > { %v500_v23 = vpop.xlane.xlu1 %499 }
 0x246   : > { %v501_v24 = vsub.f32 %v495_v13, %v500_v23 }
 0x248   : > { %v502_v25 = vmul.f32 1.442695, %v501_v24 }
 0x24a   : > { %1258 = vpow2.f32 %v502_v25 }
 0x24d   : > { %v643_v26 = vpop.xlane.xlu2 %642 }
 0x24e   : > { %v644_v27 = vsub.f32 %v638_v17, %v643_v26 }
 0x250   : > { %v1259_v28 = vpop.eup %1258  ;;  %v645_v29 = vmul.f32 1.442695, %v644_v27 }
 0x251   : > { %1144 = vmatmul.msk.f32.vlgmr.msra.gmra.mxu3 %vm434_vm1, %v1259_v28  ;;  %v504_v30 = vsel %vm434_vm1, %v1259_v28, 0.0 }
 0x252   : > { %1260 = vpow2.f32 %v645_v29  ;;  %1151 = vmatpush.xpose.msk.msra.mxu3 %vm407_vm0, %v687_v7  ;;  %505 = vadd.xlane.f32.xlu2 %v504_v30 }
 0x255   : > { %v785_v31 = vpop.xlane.xlu2 %784 }
 0x256   : > { %v786_v33 = vsub.f32 %v780_v20, %v785_v31 }
 0x258   : > { %v1261_v32 = vpop.eup %1260  ;;  %v787_v34 = vmul.f32 1.442695, %v786_v33 }
 0x259   : > { %1146 = vmatmul.msk.f32.vlgmr.msrb.gmra.mxu3 %vm407_vm0, %v543_v5  ;;  %1150 = vmatmul.msk.f32.vlgmr.msra.gmra.mxu2 %vm434_vm1, %v1261_v32  ;;  %v647_v49 = vsel %vm434_vm1, %v1261_v32, 0.0 }
 0x25a   : > { %1157 = vmatpush.xpose.msk.msrb.mxu3 %vm407_vm0, %v1687_v62  ;;  %1262 = vpow2.f32 %v787_v34 }
 0x25c   : > { %v464_v13 = vpop.f32.mrf.mxu2 }
 0x25d   : > { %v722_v35 = vpop.permute.xlu2 %721  ;;  %v898_v36 = vpop.permute.xlu1 %897 }
 0x25e   : > { %742 = vmatpush.msrb.mxu0 %v722_v35  ;;  %1161 = vmatmul.msk.f32.vlgmr.msra.gmra.mxu1 %vm407_vm0, %v898_v36 }
 0x260   : > { %v1263_v39 = vpop.eup %1262 }
 0x261   : > { %1152 = vmatmul.msk.f32.vlgmr.msra.gmra.mxu3 %vm407_vm0, %v685_v8  ;;  %v789_v50 = vsel %vm434_vm1, %v1263_v39, 0.0  ;;  %v441_v8 = vsel %vm434_vm1, %v1701_v16, 0.0 }
 0x265   : > { %v935_v37 = vpop.permute.xlu2 %934  ;;  %v793_v38 = vpop.permute.xlu1 %792 }
 0x266   : > { %813 = vmatpush.msrb.mxu2 %v793_v38 }
 0x267   : > { %1156 = vmatmul.msk.f32.vlgmr.msrb.gmra.mxu2 %vm434_vm1, %v1263_v39 }
 0x268   : > { %955 = vmatpush.msra.mxu2 %v935_v37 }
 0x269   : > { %1158 = vmatmul.msk.f32.vlgmr.msrb.gmra.mxu3 %vm407_vm0, %v827_v15 }
 0x2c5   : > { %v506_v51 = vpop.xlane.xlu2 %505 }
 0x2c6   : > { %1264 = vrcp.f32 %v506_v51  ;;  %v976_v51 = vld [vmem:[#allocation9 + $0x38] sm:$0xff] }
 0x2cc   : > { %v1265_v52 = vpop.eup %1264 }
 0x2d4   : > { %v531_v40 = vpop.f32.mrf.mxu3 }
 0x2d5   : > { %v535_v53 = vmul.f32 %v1265_v52, %v531_v40  ;;  %v975_v52 = vld [vmem:[#allocation9 + $0x30] sm:$0xff] }
 0x2db   : > { %v922_v41 = vpop.f32.mrf.mxu1 }
 0x2dc   : > { %v567_v42 = vpop.f32.mrf.mxu3  ;;  %v925_v43 = vsel %vm434_vm1, %v922_v41, -inf  ;;  %v673_v15 = vpop.f32.mrf.mxu2 }
 0x2dd   : > { %926 = vmax.xlane.f32.xlu1 %v925_v43  ;;  %v570_v45 = vsel %vm434_vm1, %v567_v42, -inf  ;;  %v982_v43 = vld [vmem:[#allocation9 + $0x68] sm:$0xff] }
 0x2e4   : > { %v709_v44 = vpop.f32.mrf.mxu3 }
 0x2e5   : > { %571 = vmax.xlane.f32.xlu1 %v570_v45  ;;  %v712_v47 = vsel %vm434_vm1, %v709_v44, -inf }
 0x2ea   : > { %v815_v19 = vpop.f32.mrf.mxu2 }
 0x2ec   : > { %v851_v46 = vpop.f32.mrf.mxu3 }
 0x2ed   : > { %713 = vmax.xlane.f32.xlu1 %v712_v47  ;;  %v854_v48 = vsel %vm434_vm1, %v851_v46, -inf  ;;  %v980_v47 = vld [vmem:[#allocation9 + $0x58] sm:$0xff] }
 0x2ee   : > { %855 = vmax.xlane.f32.xlu0 %v854_v48  ;;  %v979_v48 = vld [vmem:[#allocation9 + $0x50] sm:$0xff] }
 0x2f6   : > { %648 = vadd.xlane.f32.xlu0 %v647_v49  ;;  %v978_v49 = vld [vmem:[#allocation9 + $0x48] sm:$0xff] }
 0x2fe   : > { %790 = vadd.xlane.f32.xlu0 %v789_v50  ;;  %v977_v50 = vld [vmem:[#allocation9 + $0x40] sm:$0xff] }
 0x306   : > { %863 = vrot.lane.b32.xlu1 %v1664_v58, %s1491_s26 }
 0x312   : > { %537 = vrot.lane.b32.xlu0 %v535_v53, %s1497_s27  ;;  %v974_v53 = vld [vmem:[#allocation9 + $0x28] sm:$0xff]  ;;  %s1428_s27 = scalar_lea.hbm %s1795_s5, 16 }
 0x350   : > { %v927_v54 = vpop.xlane.xlu1 %926 }
 0x351   : > { %v928_v55 = vsub.f32 %v922_v41, %v927_v54  ;;  %v984_v41 = vld [vmem:[#allocation9 + $0x78] sm:$0xff]  ;;  %v973_v54 = vld [vmem:[#allocation9 + $0x20] sm:$0xff] }
 0x352   : > { %989 = vmatpush.msra.mxu3 %v984_v41 }
 0x353   : > { %v929_v56 = vmul.f32 1.442695, %v928_v55  ;;  %v972_v55 = vld [vmem:[#allocation9 + $0x18] sm:$0xff] }
 0x355   : > { %1266 = vpow2.f32 %v929_v56  ;;  %v971_v56 = vld [vmem:[#allocation9 + $0x10] sm:$0xff] }
 0x358   : > { %v572_v57 = vpop.xlane.xlu1 %571 }
 0x359   : > { %v573_v59 = vsub.f32 %v567_v42, %v572_v57  ;;  %v983_v42 = vld [vmem:[#allocation9 + $0x70] sm:$0xff]  ;;  %v970_v57 = vld [vmem:[#allocation9 + $0x8] sm:$0xff] }
 0x35a   : > { %990 = vmatpush.msra.mxu3 %v983_v42 }
 0x35b   : > { %v1267_v60 = vpop.eup %1266  ;;  %v574_v61 = vmul.f32 1.442695, %v573_v59  ;;  %v969_v59 = vld [vmem:[#allocation9] sm:$0xff] }
 0x35c   : > { %1162 = vmatmul.msk.f32.vlgmr.msra.gmra.mxu2 %vm434_vm1, %v1267_v60  ;;  %v931_v62 = vsel %vm434_vm1, %v1267_v60, 0.0  ;;  %991 = vmatpush.msra.mxu3 %v982_v43 }
 0x35d   : > { %1268 = vpow2.f32 %v574_v61  ;;  %932 = vadd.xlane.f32.xlu2 %v931_v62 }
 0x360   : > { %v714_v58 = vpop.xlane.xlu1 %713 }
 0x361   : > { %v715_v63 = vsub.f32 %v709_v44, %v714_v58  ;;  %v856_v0 = vpop.xlane.xlu0 %855  ;;  %v981_v44 = vld [vmem:[#allocation9 + $0x60] sm:$0xff] }
 0x362   : > { %v857_v3 = vsub.f32 %v851_v46, %v856_v0  ;;  %992 = vmatpush.msra.mxu3 %v981_v44  ;;  %v1255_v0 = vld [vmem:[%s1794_s4] ss:$0 sm:$0xff] }
 0x363   : > { %v1269_v1 = vpop.eup %1268  ;;  %v716_v2 = vmul.f32 1.442695, %v715_v63 }
 0x364   : > { %1147 = vmatmul.msk.f32.vlgmr.msra.gmra.mxu0 %vm434_vm1, %v1269_v1  ;;  %v576_v4 = vsel %vm434_vm1, %v1269_v1, 0.0  ;;  %v858_v5 = vmul.f32 1.442695, %v857_v3  ;;  %993 = vmatpush.msra.mxu3 %v980_v47 }
 0x365   : > { %1270 = vpow2.f32 %v716_v2  ;;  %577 = vadd.xlane.f32.xlu1 %v576_v4 }
 0x366   : > { %1272 = vpow2.f32 %v858_v5  ;;  %994 = vmatpush.msra.mxu3 %v979_v48 }
 0x368   : > { %995 = vmatpush.msra.mxu3 %v978_v49 }
 0x369   : > { %v649_v11 = vpop.xlane.xlu0 %648 }
 0x36a   : > { %1274 = vrcp.f32 %v649_v11  ;;  %996 = vmatpush.msra.mxu3 %v977_v50 }
 0x36b   : > { %v1271_v6 = vpop.eup %1270 }
 0x36c   : > { %1153 = vmatmul.msk.f32.vlgmr.msrb.gmra.mxu0 %vm434_vm1, %v1271_v6  ;;  %v718_v7 = vsel %vm434_vm1, %v1271_v6, 0.0  ;;  %v1273_v9 = vpop.eup %1272  ;;  %997 = vmatpush.msra.mxu3 %v976_v51 }
 0x36d   : > { %719 = vadd.xlane.f32.xlu0 %v718_v7  ;;  %442 = vadd.xlane.f32.xlu1 %v441_v8  ;;  %v860_v10 = vsel %vm434_vm1, %v1273_v9, 0.0 }
 0x36e   : > { %998 = vmatpush.msra.mxu3 %v975_v52 }
 0x370   : > { %v1275_v14 = vpop.eup %1274  ;;  %999 = vmatpush.msra.mxu3 %v974_v53 }
 0x371   : > { %v677_v17 = vmul.f32 %v1275_v14, %v673_v15  ;;  %v791_v18 = vpop.xlane.xlu0 %790 }
 0x372   : > { %1000 = vmatpush.msra.mxu3 %v973_v54 }
 0x374   : > { %1001 = vmatpush.msra.mxu3 %v972_v55 }
 0x375   : > { %861 = vadd.xlane.f32.xlu0 %v860_v10 }
 0x376   : > { %1002 = vmatpush.msra.mxu3 %v971_v56 }
 0x378   : > { %v864_v12 = vpop.permute.xlu1 %863  ;;  %1003 = vmatpush.msra.mxu3 %v970_v57 }
 0x379   : > { %884 = vmatpush.msra.mxu0 %v864_v12 }
 0x37a   : > { %1159 = vmatmul.msk.f32.vlgmr.msra.gmra.mxu0 %vm434_vm1, %v1273_v9  ;;  %1004 = vmatpush.msra.mxu3 %v969_v59 }
 0x384   : > { %v538_v20 = vpop.permute.xlu0 %537 }
 0x386   : > { %679 = vrot.lane.b32.xlu1 %v677_v17, %s1495_s17 }
 0x3d0   : > { %v933_v16 = vpop.xlane.xlu2 %932 }
 0x3d1   : > { %1276 = vrcp.f32 %v933_v16 }
 0x3d7   : > { %v1277_v22 = vpop.eup %1276 }
 0x3d8   : > { %v578_v21 = vpop.xlane.xlu1 %577 }
 0x3d9   : > { %1278 = vrcp.f32 %v578_v21 }
 0x3da   : > { %1280 = vrcp.f32 %v791_v18 }
 0x3df   : > { %v957_v23 = vpop.f32.mrf.mxu2  ;;  %v1279_v27 = vpop.eup %1278 }
 0x3e0   : > { %v961_v24 = vmul.f32 %v1277_v22, %v957_v23  ;;  %v443_v25 = vpop.xlane.xlu1 %442  ;;  %v720_v26 = vpop.xlane.xlu0 %719 }
 0x3e1   : > { %1282 = vrcp.f32 %v443_v25  ;;  %v602_v28 = vpop.f32.mrf.mxu0  ;;  %v1281_v30 = vpop.eup %1280 }
 0x3e2   : > { %v606_v29 = vmul.f32 %v1279_v27, %v602_v28  ;;  %963 = vrot.lane.b32.xlu1 %v961_v24, %s1493_s14  ;;  %1284 = vrcp.f32 %v720_v26  ;;  %v819_v36 = vmul.f32 %v1281_v30, %v815_v19  ;;  %s1011_s14 = scalar_lea.sflag [#allocation5], %s1635_s7 }
 0x3e4   : > { %608 = vrot.lane.b32.xlu2 %v606_v29, %s1491_s26  ;;  %s1023_s26 = sshll.u32 %s289_s23, 4  ;;  %s1024_s26 = int_to_ptr.vmem [resolvable:$true] %s1023_s26 }
 0x3e7   : > { %v1283_v31 = vpop.eup %1282 }
 0x3e8   : > { %v468_v32 = vmul.f32 %v1283_v31, %v464_v13  ;;  %v1285_v33 = vpop.eup %1284  ;;  %v862_v37 = vpop.xlane.xlu0 %861 }
 0x3e9   : > { %v744_v34 = vpop.f32.mrf.mxu0  ;;  %1286 = vrcp.f32 %v862_v37 }
 0x3ea   : > { %469 = vst.msk [vmem:[#allocation2] sm:$0xff] %vm407_vm0, %v468_v32  ;;  %v748_v35 = vmul.f32 %v1285_v33, %v744_v34 }
 0x3eb   : > { %541 = vst.msk [vmem:[#allocation2] sm:$0xff] %vm540_vm2, %v538_v20 }
 0x3ec   : > { %821 = vrot.lane.b32.xlu2 %v819_v36, %s1494_s16  ;;  %750 = vrot.lane.b32.xlu0 %v748_v35, %s1496_s22 }
 0x3ef   : > { %v1287_v38 = vpop.eup %1286 }
 0x3f7   : > { %v886_v39 = vpop.f32.mrf.mxu0 }
 0x3f8   : > { %v890_v40 = vmul.f32 %v1287_v38, %v886_v39  ;;  %v680_v46 = vpop.permute.xlu1 %679 }
 0x3fa   : > { %892 = vrot.lane.b32.xlu0 %v890_v40, %s1492_s30  ;;  %s1025_s30 = sshll.u32 %s1021_s11, 4  ;;  %s1026_s30 = int_to_ptr.hbm [resolvable:$true] %s1025_s30 }
 0x3fb   : > { %s1422_s25 = sshra.s32 %s1026_s30, 4  ;;  %s1423_s25 = int_to_ptr.hbm [resolvable:$true] %s1422_s25 }
 0x3fc   : > { %s1424_s16 = scalar_lea.hbm %s1423_s25, 8  ;;  %p1429_p12 = scmp.lt.s32.totalorder %s1423_s25, %s1795_s5 }
 0x3fd   : > { %p1425_p1 = scmp.ne.s32.totalorder %s1423_s25, %s1424_s16  ;;  %p1430_p8 = scmp.lt.s32.totalorder %s1428_s27, %s1424_s16 }
 0x3ff   : > { %p1426_p3 = pnand %p1425_p1, %p1604_p13  ;;  %p1431_p7 = por %p1430_p8, %p1429_p12 }
 0x401   : > { %p1427_p5 = pneg %p1426_p3 }
 0x403   : > { %p1432_p9 = pnand %p1431_p7, %p1427_p5 }
 0x43e   : > { %v609_v45 = vpop.permute.xlu2 %608 }
 0x43f   : > { %612 = vst.msk [vmem:[#allocation2] sm:$0xff] %vm611_vm3, %v609_v45 }
 0x440   : > { %683 = vst.msk [vmem:[#allocation2] sm:$0xff] %vm682_vm4, %v680_v46 }
 0x446   : > { %v822_v61 = vpop.permute.xlu2 %821 }
 0x454   : > { %v964_v58 = vpop.permute.xlu1 %963 }
 0x45e   : > { %v751_v60 = vpop.permute.xlu0 %750 }
 0x45f   : > { %754 = vst.msk [vmem:[#allocation2] sm:$0xff] %vm753_vm5, %v751_v60 }
 0x460   : > { %825 = vst.msk [vmem:[#allocation2] sm:$0xff] %vm824_vm6, %v822_v61 }
 0x46c   : > { %v893_v62 = vpop.permute.xlu0 %892 }
 0x46d   : > { %896 = vst.msk [vmem:[#allocation2] sm:$0xff] %vm895_vm7, %v893_v62 }
 0x46e   : > { %967 = vst.msk [vmem:[#allocation2] sm:$0xff] %vm966_vm8, %v964_v58 }
 0x475   : > { %v968_v63 = vld [vmem:[#allocation2] sm:$0xff] }
 0x476   : > { %1005 = vmatmul.f32.vlgmr.msra.gmra.mxu3 %v968_v63 }
 0x4f9   : > { %v1006_v1 = vpop.f32.mrf.mxu3 }
 0x4fa   : > { %v1007_v2 = vadd.f32 %v1255_v0, %v1006_v1 }
 0x4fc   : > { %1009 = vst [vmem:[%s289_s23] sm:$0xff] %v1007_v2 }
 0x4fd   : > { %1435 = shalt.err (!%p1432_p9)
}
 0x4fe   : > { %1181 = dma.vmem_to_hbm [thread:$0]  (%p1604_p13), %s1024_s26, 128, %s1026_s30, %s1011_s14  }
 0x4ff PF: > { %s1037_s7 = sand.u32 1, %s1470_s18   ;;  %p1802_p10 = scmp.ge.s32.totalorder %s1482_s21, 2 }
 0x500   : > { %s1038_s10 = scalar_lea.sflag [#allocation5], %s1037_s7 }
 0x501   : > { %p1198_p11 = pnand %p1802_p10, %p1609_p4 }
 0x503   : > { %p1199_p0 = pneg %p1198_p11 }
 0x505   : > { %1465 = dma.done.wait (%p1199_p0), %s1038_s10, 128  }
 0x506   : > { %1467 = vsyncadd (%p1199_p0), %s1038_s10, 4294967168  ;;  %p20_p2 = scmp.ge.s32.totalorder %s1584_s24, 4   ;;  %s1803_s18 = smov %s1474_s19 }
 0x507   : > { %s1804_s19 = smov %s1478_s20  ;;  %s1805_s20 = smov %s1596_s29 }
 0x508   : > { %s1806_s21 = smov %s1584_s24  ;;  %22 = sbr.rel (!%p20_p2) target bundleno = 7 (0x7), region = 97 }
 0x50d   :  { %1044 = vsyncpa [#allocation4], 1 }
 0x50e   :  { %1046 = vsyncpa [#allocation4 + $0x1], 1 }
 0x50f   :  { %1047 = vsyncpa [#allocation7], 1 }
 0x510   :  { %1048 = vsyncpa [#allocation10], 1 }
 0x511   :  { %1049 = vsyncpa [#allocation5], 1 }
 0x512   :  { %1051 = vsyncpa [#allocation5 + $0x1], 1 }

</bundles_post_ra>
